<compile_context>
chip_gen: v7x
topology: tpu7x:2x2x1
jax: 0.10.0
libtpu: 0.0.40
codegen_flags: <defaults>
</compile_context>

<pallas_src>
import jax
import jax.numpy as jnp
from jax import lax
from jax.experimental import pallas as pl
from jax.experimental.pallas import tpu as pltpu

_LANE = 128


def _round_up(v, m):
    return ((v + m - 1) // m) * m


def make_bone_encoder_kernel(num_layers):
    """Fused kernel: gcn_norm (once) + num_layers x (linear -> aggregate -> bias -> ReLU)."""

    def kernel(adj_ref, x_ref, *rest):
        o_ref = rest[-1]
        wb = rest[:-1]                                   # w0, b0, w1, b1, ...
        n = adj_ref.shape[0]
        f32 = jnp.float32

        # ---- gcn_norm: computed once, stays resident for the whole stack ----
        row = lax.broadcasted_iota(jnp.int32, (n, n), 0)
        col = lax.broadcasted_iota(jnp.int32, (n, n), 1)
        # A_hat: binary pattern of adj with a forced unit diagonal (self-loops);
        # matches dense_to_sparse (values dropped) + add_remaining_self_loops.
        a_hat = jnp.where(row == col, 1.0, (adj_ref[...] != 0.0).astype(f32))
        # Degrees (>= 1 thanks to the diagonal).  For the undirected bone graph the
        # row sums equal the column sums; each is computed in its natural layout so
        # no transpose / non-standard contraction is ever materialized in-kernel.
        deg_c = jnp.sum(a_hat, axis=1, keepdims=True)     # (n, 1)
        deg_r = jnp.sum(a_hat, axis=0, keepdims=True)     # (1, n)
        # Fully normalized adjacency S = D^-1/2 A_hat D^-1/2 — both scalings folded
        # here once instead of rescaling the activations every layer.
        s_norm = (lax.rsqrt(deg_c) * a_hat) * lax.rsqrt(deg_r)       # (n, n)

        # ---- GCN layer stack (unrolled; weights stay VMEM-resident) ---------
        x = x_ref[...]                                    # (n, c_in)  raw
        for l in range(num_layers):
            w = wb[2 * l][...]                            # (c_in_l, c_out_l), lane-dense
            b = wb[2 * l + 1][...]                        # (1, c_out_l)
            xw = jnp.dot(x, w, preferred_element_type=f32)            # MXU
            agg = jnp.dot(s_norm, xw, preferred_element_type=f32)     # MXU
            x = jnp.maximum(agg + b, 0.0)                 # bias + ReLU on the VPU

        o_ref[...] = x                                    # (n, out_channels) raw

    return kernel


def init_params(key, in_channels, hidden_channels, out_channels, num_layers):
    """GCNConv parameters, stored the way the kernel wants them (perf review #1):
    W is (C_in, C_out) (pre-transposed) and zero-padded ONCE here so every hidden
    dimension is a 128-lane multiple; the first layer keeps its raw input dim and
    the last layer its raw output dim, so the per-call path needs no pad/slice ops.
    Glorot-uniform weights, zero bias — mirrors GCNConv.reset_parameters."""
    dims = [in_channels] + [hidden_channels] * (num_layers - 1) + [out_channels]
    params = []
    for i in range(num_layers):
        key, sub = jax.random.split(key)
        c_in, c_out = dims[i], dims[i + 1]
        bound = (6.0 / (c_in + c_out)) ** 0.5
        w = jax.random.uniform(sub, (c_in, c_out), jnp.float32, -bound, bound)
        c_in_pad = c_in if i == 0 else _round_up(c_in, _LANE)
        c_out_pad = c_out if i == num_layers - 1 else _round_up(c_out, _LANE)
        w = jnp.pad(w, ((0, c_in_pad - c_in), (0, c_out_pad - c_out)))
        b = jnp.zeros((1, c_out_pad), jnp.float32)
        params.append((w, b))
    return params


def bone_encoder_forward(bone_features, bone_adj, params):
    """bone_features: (n, in_channels); bone_adj: (n, n) dense adjacency (only its
    nonzero pattern matters, exactly as in dense_to_sparse).  Returns (n, out_ch)."""
    n = bone_features.shape[0]
    num_layers = len(params)
    out_channels = params[-1][0].shape[1]

    # No per-call pads / transposes / casts (astype on f32 inputs is a no-op):
    # raw arrays go straight to VMEM; all padding happened once in init_params.
    x = bone_features.astype(jnp.float32)
    adj = bone_adj.astype(jnp.float32)
    flat_params = [t for wb in params for t in wb]

    # Advisory cost hint so XLA schedules this tiny custom call sensibly.
    flops = 6 * n * n                                   # normalization
    for w, _ in params:
        k, m = w.shape
        flops += 2 * n * k * m + 2 * n * n * m          # x @ W  and  S @ (xW)
    bytes_accessed = 4 * (adj.size + x.size + sum(p.size for p in flat_params)
                          + n * out_channels)

    vmem = pl.BlockSpec(memory_space=pltpu.MemorySpace.VMEM)
    return pl.pallas_call(
        make_bone_encoder_kernel(num_layers),
        out_shape=jax.ShapeDtypeStruct((n, out_channels), jnp.float32),
        in_specs=[vmem] * (2 + len(flat_params)),
        out_specs=vmem,
        cost_estimate=pl.CostEstimate(flops=int(flops), transcendentals=2 * n,
                                      bytes_accessed=int(bytes_accessed)),
    )(adj, x, *flat_params)


if __name__ == "__main__":
    key = jax.random.PRNGKey(0)
    k_feat, k_adj, k_params = jax.random.split(key, 3)

    num_bones = 16
    in_channels = 8
    hidden_channels = 32
    out_channels = 16
    num_layers = 3

    bone_features = jax.random.normal(k_feat, (num_bones, in_channels), jnp.float32)

    # Symmetric, sparse-ish bone adjacency; only its zero/non-zero pattern matters,
    # exactly as in the PyTorch reference (dense_to_sparse weights are dropped).
    raw = jax.random.uniform(k_adj, (num_bones, num_bones), jnp.float32)
    raw = 0.5 * (raw + raw.T)
    bone_adj = jnp.where(raw > 0.6, raw, 0.0)

    params = init_params(k_params, in_channels, hidden_channels, out_channels,
                         num_layers)

    out = jax.jit(bone_encoder_forward)(bone_features, bone_adj, params)
    jax.block_until_ready(out)

    assert out.shape == (num_bones, out_channels)
    assert bool(jnp.all(out >= 0.0))   # ReLU output
    print("KERNEL_OK")
</pallas_src>

<mosaic_0001>
module attributes {stable_mosaic.version = 11 : i64} {
  func.func @kernel(%arg0: memref<16x16xf32, #tpu.memory_space<vmem>>, %arg1: memref<16x8xf32, #tpu.memory_space<vmem>>, %arg2: memref<8x128xf32, #tpu.memory_space<vmem>>, %arg3: memref<1x128xf32, #tpu.memory_space<vmem>>, %arg4: memref<128x128xf32, #tpu.memory_space<vmem>>, %arg5: memref<1x128xf32, #tpu.memory_space<vmem>>, %arg6: memref<128x16xf32, #tpu.memory_space<vmem>>, %arg7: memref<1x16xf32, #tpu.memory_space<vmem>>, %arg8: memref<16x16xf32, #tpu.memory_space<vmem>>) attributes {dimension_semantics = [], scalar_prefetch = 0 : i64, scratch_operands = 0 : i64, tpu.core_type = #tpu.core_type<tc>} {
    %0 = tpu.iota {dimensions = array<i32: 0>} : vector<16x16xi32>
    %1 = tpu.iota {dimensions = array<i32: 1>} : vector<16x16xi32>
    %2 = arith.cmpi eq, %0, %1 : vector<16x16xi32>
    %c0 = arith.constant 0 : index
    %c0_0 = arith.constant 0 : index
    %3 = vector.load %arg0[%c0, %c0_0] : memref<16x16xf32, #tpu.memory_space<vmem>>, vector<16x16xf32>
    %cst = arith.constant 0.000000e+00 : f32
    %4 = vector.broadcast %cst : f32 to vector<16x16xf32>
    %5 = arith.cmpf one, %3, %4 : vector<16x16xf32>
    %6 = arith.extui %5 : vector<16x16xi1> to vector<16x16xi32>
    %7 = arith.sitofp %6 : vector<16x16xi32> to vector<16x16xf32>
    %cst_1 = arith.constant 1.000000e+00 : f32
    %8 = vector.broadcast %cst_1 : f32 to vector<16x16xf32>
    %9 = arith.select %2, %8, %7 : vector<16x16xi1>, vector<16x16xf32>
    %cst_2 = arith.constant dense<0.000000e+00> : vector<16xf32>
    %10 = vector.multi_reduction <add>, %9, %cst_2 [1] : vector<16x16xf32> to vector<16xf32>
    %11 = vector.shape_cast %10 : vector<16xf32> to vector<16x1xf32>
    %cst_3 = arith.constant dense<0.000000e+00> : vector<16xf32>
    %12 = vector.multi_reduction <add>, %9, %cst_3 [0] : vector<16x16xf32> to vector<16xf32>
    %13 = vector.shape_cast %12 : vector<16xf32> to vector<1x16xf32>
    %14 = math.rsqrt %11 : vector<16x1xf32>
    %15 = vector.broadcast %14 : vector<16x1xf32> to vector<16x16xf32>
    %16 = arith.mulf %15, %9 : vector<16x16xf32>
    %17 = math.rsqrt %13 : vector<1x16xf32>
    %18 = vector.broadcast %17 : vector<1x16xf32> to vector<16x16xf32>
    %19 = arith.mulf %16, %18 : vector<16x16xf32>
    %c0_4 = arith.constant 0 : index
    %c0_5 = arith.constant 0 : index
    %20 = vector.load %arg1[%c0_4, %c0_5] : memref<16x8xf32, #tpu.memory_space<vmem>>, vector<16x8xf32>
    %c0_6 = arith.constant 0 : index
    %c0_7 = arith.constant 0 : index
    %21 = vector.load %arg2[%c0_6, %c0_7] : memref<8x128xf32, #tpu.memory_space<vmem>>, vector<8x128xf32>
    %c0_8 = arith.constant 0 : index
    %c0_9 = arith.constant 0 : index
    %22 = vector.load %arg3[%c0_8, %c0_9] : memref<1x128xf32, #tpu.memory_space<vmem>>, vector<1x128xf32>
    %cst_10 = arith.constant dense<0.000000e+00> : vector<16x128xf32>
    %23 = tpu.matmul %20, %21, %cst_10 {dimension_numbers = #tpu.dot_dimension_numbers<[1], [0], [0], [1], [0, 0, 1, 1], [], []>} : vector<16x8xf32>, vector<8x128xf32>, vector<16x128xf32> -> vector<16x128xf32>
    %cst_11 = arith.constant dense<0.000000e+00> : vector<16x128xf32>
    %24 = tpu.matmul %19, %23, %cst_11 {dimension_numbers = #tpu.dot_dimension_numbers<[1], [0], [0], [1], [0, 0, 1, 1], [], []>} : vector<16x16xf32>, vector<16x128xf32>, vector<16x128xf32> -> vector<16x128xf32>
    %25 = vector.broadcast %22 : vector<1x128xf32> to vector<16x128xf32>
    %26 = arith.addf %24, %25 : vector<16x128xf32>
    %cst_12 = arith.constant 0.000000e+00 : f32
    %27 = vector.broadcast %cst_12 : f32 to vector<16x128xf32>
    %28 = arith.maximumf %26, %27 : vector<16x128xf32>
    %c0_13 = arith.constant 0 : index
    %c0_14 = arith.constant 0 : index
    %29 = vector.load %arg4[%c0_13, %c0_14] : memref<128x128xf32, #tpu.memory_space<vmem>>, vector<128x128xf32>
    %c0_15 = arith.constant 0 : index
    %c0_16 = arith.constant 0 : index
    %30 = vector.load %arg5[%c0_15, %c0_16] : memref<1x128xf32, #tpu.memory_space<vmem>>, vector<1x128xf32>
    %cst_17 = arith.constant dense<0.000000e+00> : vector<16x128xf32>
    %31 = tpu.matmul %28, %29, %cst_17 {dimension_numbers = #tpu.dot_dimension_numbers<[1], [0], [0], [1], [0, 0, 1, 1], [], []>} : vector<16x128xf32>, vector<128x128xf32>, vector<16x128xf32> -> vector<16x128xf32>
    %cst_18 = arith.constant dense<0.000000e+00> : vector<16x128xf32>
    %32 = tpu.matmul %19, %31, %cst_18 {dimension_numbers = #tpu.dot_dimension_numbers<[1], [0], [0], [1], [0, 0, 1, 1], [], []>} : vector<16x16xf32>, vector<16x128xf32>, vector<16x128xf32> -> vector<16x128xf32>
    %33 = vector.broadcast %30 : vector<1x128xf32> to vector<16x128xf32>
    %34 = arith.addf %32, %33 : vector<16x128xf32>
    %cst_19 = arith.constant 0.000000e+00 : f32
    %35 = vector.broadcast %cst_19 : f32 to vector<16x128xf32>
    %36 = arith.maximumf %34, %35 : vector<16x128xf32>
    %c0_20 = arith.constant 0 : index
    %c0_21 = arith.constant 0 : index
    %37 = vector.load %arg6[%c0_20, %c0_21] : memref<128x16xf32, #tpu.memory_space<vmem>>, vector<128x16xf32>
    %c0_22 = arith.constant 0 : index
    %c0_23 = arith.constant 0 : index
    %38 = vector.load %arg7[%c0_22, %c0_23] : memref<1x16xf32, #tpu.memory_space<vmem>>, vector<1x16xf32>
    %cst_24 = arith.constant dense<0.000000e+00> : vector<16x16xf32>
    %39 = tpu.matmul %36, %37, %cst_24 {dimension_numbers = #tpu.dot_dimension_numbers<[1], [0], [0], [1], [0, 0, 1, 1], [], []>} : vector<16x128xf32>, vector<128x16xf32>, vector<16x16xf32> -> vector<16x16xf32>
    %cst_25 = arith.constant dense<0.000000e+00> : vector<16x16xf32>
    %40 = tpu.matmul %19, %39, %cst_25 {dimension_numbers = #tpu.dot_dimension_numbers<[1], [0], [0], [1], [0, 0, 1, 1], [], []>} : vector<16x16xf32>, vector<16x16xf32>, vector<16x16xf32> -> vector<16x16xf32>
    %41 = vector.broadcast %38 : vector<1x16xf32> to vector<16x16xf32>
    %42 = arith.addf %40, %41 : vector<16x16xf32>
    %cst_26 = arith.constant 0.000000e+00 : f32
    %43 = vector.broadcast %cst_26 : f32 to vector<16x16xf32>
    %44 = arith.maximumf %42, %43 : vector<16x16xf32>
    %c0_27 = arith.constant 0 : index
    %c0_28 = arith.constant 0 : index
    %45 = vector.load %arg8[%c0_27, %c0_28] : memref<16x16xf32, #tpu.memory_space<vmem>>, vector<16x16xf32>
    tpu.vector_store %arg8[%c0_27, %c0_28], %44 {strides = array<i32>} : memref<16x16xf32, #tpu.memory_space<vmem>>, vector<16x16xf32>,
    return
  }
}

</mosaic_0001>

<bundles_post_ra>
// kernel: bone_encoder_forward.1
= control target key start
LH: loop header
LB: loop body
LE: loop exit
PB: predicated region body
PF: predicated region fallthrough
CT: control target
= control target key end

     0   :  { %vm72_vm0 = vcmask 64512   ;;  %v30_v3 = vlaneseq  ;;  %s1077_s0 = inlined_call_operand.vmem [shape: f32[16,16], index: 0, kind: input, shape index: {}]   ;;  %s1078_s1 = inlined_call_operand.vmem [shape: f32[16,8], index: 1, kind: input, shape index: {}]   ;;  %s1079_s2 = inlined_call_operand.vmem [shape: f32[8,128], index: 2, kind: input, shape index: {}]   ;;  %s1080_s3 = inlined_call_operand.vmem [shape: f32[1,128], index: 3, kind: input, shape index: {}]   ;;  %s1081_s4 = inlined_call_operand.vmem [shape: f32[128,128], index: 4, kind: input, shape index: {}]   ;;  %s1082_s5 = inlined_call_operand.vmem [shape: f32[1,128], index: 5, kind: input, shape index: {}]   ;;  %s1083_s6 = inlined_call_operand.vmem [shape: f32[128,16], index: 6, kind: input, shape index: {}]   ;;  %s1084_s7 = inlined_call_operand.vmem [shape: f32[1,16], index: 7, kind: input, shape index: {}]   ;;  %s1085_s8 = inlined_call_operand.hbm [shape: f32[16,16], index: 8, kind: output, shape index: {}]  }
   0x1   :  { %v70_v0 = vld [vmem:[%s1079_s2] sm:$0xff]  ;;  %v69_v2 = vld [vmem:[%s1078_s1 + $0x8] sm:$0xff] }
   0x2   :  { %v68_v1 = vld [vmem:[%s1078_s1] sm:$0xff]  ;;  %675 = vmatprep.subr.mxu0 %v70_v0  ;;  %v38_v5 = vld [vmem:[%s1077_s0 + $0x8] sm:$0xff] }
   0x3   :  { %677 = vmatprep.mubr.msk.f32.mxu0 %vm72_vm0, %v68_v1  ;;  %v37_v4 = vld [vmem:[%s1077_s0] sm:$0xff] }
   0x4   :  { %13 = vsyncpa [#allocation3], 0  ;;  %676 = vmatpush3.msra.mxu0 %v70_v0  ;;  %v31_v6 = vshrl.u32 %v30_v3, 7  ;;  %v34_v7 = vand.u32 127, %v30_v3  ;;  %vm39_vm1 = vcmp.ne.f32.partialorder %v37_v4, 0.0  ;;  %vm40_vm2 = vcmp.ne.f32.partialorder %v38_v5, 0.0 }
   0x5   :  { %678 = vmatmul.mubr.msk.f32.vlgmr.msra.gmra.mrb[0].mxu0 %vm72_vm0, %v69_v2  ;;  %v881_v8 = vmov 0.0   ;;  %vm47_vm3 = vcmask 130048   ;;  %v243_v17 = vld [vmem:[%s1081_s4] sm:$0xff]  ;;  %v244_v18 = vld [vmem:[%s1081_s4 + $0x8] sm:$0xff]  ;;  %v245_v19 = vld [vmem:[%s1081_s4 + $0x10] sm:$0xff] }
   0x6   :  { %v611_v9 = vsel %vm39_vm1, 1.0, %v881_v8  ;;  %vm35_vm4 = vcmp.eq.s32.totalorder %v31_v6, %v34_v7  ;;  %v32_v10 = vadd.s32 8, %v31_v6  ;;  %v612_v11 = vsel %vm40_vm2, 1.0, %v881_v8  ;;  %v246_v21 = vld [vmem:[%s1081_s4 + $0x18] sm:$0xff]  ;;  %v247_v23 = vld [vmem:[%s1081_s4 + $0x20] sm:$0xff]  ;;  %v248_v24 = vld [vmem:[%s1081_s4 + $0x28] sm:$0xff] }
   0x7   :  { %v45_v12 = vsel %vm35_vm4, 1.0, %v611_v9  ;;  %v775_v20 = vpack.c.bf16 %v244_v18, %v243_v17  ;;  %v779_v22 = vpack.c.bf16 %v246_v21, %v245_v19  ;;  %v783_v25 = vpack.c.bf16 %v248_v24, %v247_v23  ;;  %v249_v26 = vld [vmem:[%s1081_s4 + $0x30] sm:$0xff]  ;;  %v250_v27 = vld [vmem:[%s1081_s4 + $0x38] sm:$0xff]  ;;  %v251_v29 = vld [vmem:[%s1081_s4 + $0x40] sm:$0xff] }
   0x8   :  { %v48_v13 = vsel %vm47_vm3, %v45_v12, 0.0  ;;  %vm36_vm5 = vcmp.eq.s32.totalorder %v32_v10, %v34_v7  ;;  %v787_v28 = vpack.c.bf16 %v250_v27, %v249_v26  ;;  %v252_v30 = vld [vmem:[%s1081_s4 + $0x48] sm:$0xff]  ;;  %v253_v32 = vld [vmem:[%s1081_s4 + $0x50] sm:$0xff]  ;;  %v254_v33 = vld [vmem:[%s1081_s4 + $0x58] sm:$0xff] }
   0x9   :  { %49 = vadd.xlane.f32.xlu0 %v48_v13  ;;  %v46_v14 = vsel %vm36_vm5, 1.0, %v612_v11  ;;  %776 = vmatprep.subr.bf16.mxu0 %v775_v20  ;;  %v791_v31 = vpack.c.bf16 %v252_v30, %v251_v29  ;;  %v795_v34 = vpack.c.bf16 %v254_v33, %v253_v32  ;;  %v255_v35 = vld [vmem:[%s1081_s4 + $0x60] sm:$0xff]  ;;  %v256_v36 = vld [vmem:[%s1081_s4 + $0x68] sm:$0xff]  ;;  %v257_v56 = vld [vmem:[%s1081_s4 + $0x70] sm:$0xff] }
   0xa   :  { %v51_v15 = vsel %vm47_vm3, %v46_v14, 0.0  ;;  %778 = vmatpush3.bf16.msra.mxu0 %v775_v20  ;;  %v799_v37 = vpack.c.bf16 %v256_v36, %v255_v35  ;;  %v258_v57 = vld [vmem:[%s1081_s4 + $0x78] sm:$0xff]  ;;  %v615_v59 = vld [vmem:[%s1080_s3] ss:$0 sm:$0xff]  ;;  %v419_v3 = vld [vmem:[%s1083_s6 + $0x8] sm:$0xff] }
   0xb   :  { %v54_v16 = vadd.f32 %v51_v15, %v48_v13  ;;  %780 = vmatprep.subr.bf16.mxu0 %v779_v22  ;;  %v803_v58 = vpack.c.bf16 %v258_v57, %v257_v56  ;;  %v418_v2 = vld [vmem:[%s1083_s6] sm:$0xff]  ;;  %v420_v8 = vld [vmem:[%s1083_s6 + $0x10] sm:$0xff]  ;;  %v421_v9 = vld [vmem:[%s1083_s6 + $0x18] sm:$0xff] }
   0xc   :  { %v811_v7 = vpack.c.bf16 %v419_v3, %v418_v2  ;;  %v815_v10 = vpack.c.bf16 %v421_v9, %v420_v8  ;;  %v422_v11 = vld [vmem:[%s1083_s6 + $0x20] sm:$0xff]  ;;  %v427_v18 = vld [vmem:[%s1083_s6 + $0x48] sm:$0xff]  ;;  %v428_v20 = vld [vmem:[%s1083_s6 + $0x50] sm:$0xff] }
   0xd   :  { %52 = vadd.xlane.f32.xlu0 %v51_v15  ;;  %v55_v38 = vrot.slane %v54_v16, 4  ;;  %v425_v15 = vld [vmem:[%s1083_s6 + $0x38] sm:$0xff]  ;;  %v426_v17 = vld [vmem:[%s1083_s6 + $0x40] sm:$0xff]  ;;  %v431_v24 = vld [vmem:[%s1083_s6 + $0x68] sm:$0xff] }
   0xe   :  { %782 = vmatpush3.bf16.msra.mxu0 %v779_v22  ;;  %v827_v19 = vpack.c.bf16 %v427_v18, %v426_v17  ;;  %v429_v21 = vld [vmem:[%s1083_s6 + $0x58] sm:$0xff]  ;;  %v430_v23 = vld [vmem:[%s1083_s6 + $0x60] sm:$0xff]  ;;  %v432_v26 = vld [vmem:[%s1083_s6 + $0x70] sm:$0xff] }
   0xf   :  { %784 = vmatprep.subr.bf16.mxu0 %v783_v25  ;;  %v56_v39 = vadd.f32 %v55_v38, %v54_v16  ;;  %v831_v22 = vpack.c.bf16 %v429_v21, %v428_v20  ;;  %v433_v27 = vld [vmem:[%s1083_s6 + $0x78] sm:$0xff]  ;;  %v618_v29 = vld [vmem:[%s1082_s5] ss:$0 sm:$0xff]  ;;  %s882_s5 = smov [#allocation2]  }
  0x10   :  { %s600_s27 = sshll.u32 %s882_s5, 4  ;;  %s601_s27 = int_to_ptr.vmem [resolvable:$true] %s600_s27 }
  0x11   :  { %v57_v40 = vrot.slane %v56_v39, 2  ;;  %s857_s28 = scalar_lea.vmem %s601_s27, 256  ;;  %p862_p1 = scmp.lt.s32.totalorder %s601_s27, %s601_s27 }
  0x12   :  { %786 = vmatpush3.bf16.msra.mxu0 %v783_v25  ;;  %v835_v25 = vpack.c.bf16 %v431_v24, %v430_v23  ;;  %p858_p0 = scmp.ne.s32.totalorder %s601_s27, %s857_s28  ;;  %p863_p2 = scmp.lt.s32.totalorder %s857_s28, %s857_s28 }
  0x13   :  { %788 = vmatprep.subr.bf16.mxu0 %v787_v28  ;;  %v58_v41 = vadd.f32 %v57_v40, %v56_v39  ;;  %v621_v39 = vld [vmem:[%s1084_s7] ss:$0 sm:$0xff] }
  0x14   :  { %p864_p3 = por %p863_p2, %p862_p1 }
  0x15   :  { %v59_v42 = vrot.slane %v58_v41, 1 }
  0x16   :  { %790 = vmatpush3.bf16.msra.mxu0 %v787_v28  ;;  %v839_v28 = vpack.c.bf16 %v433_v27, %v432_v26  ;;  %p865_p4 = pnand %p864_p3, %p858_p0 }
  0x17   :  { %792 = vmatprep.subr.bf16.mxu0 %v791_v31  ;;  %v60_v43 = vadd.f32 %v59_v42, %v58_v41 }
  0x19   :  { %851 = vrsqrt.f32 %v60_v43 }
  0x1a   :  { %794 = vmatpush3.bf16.msra.mxu0 %v791_v31 }
  0x1b   :  { %796 = vmatprep.subr.bf16.mxu0 %v795_v34 }
  0x1e   :  { %798 = vmatpush3.bf16.msra.mxu0 %v795_v34 }
  0x1f   :  { %800 = vmatprep.subr.bf16.mxu0 %v799_v37 }
  0x22   :  { %802 = vmatpush3.bf16.msra.mxu0 %v799_v37 }
  0x23   :  { %v852_v45 = vpop.eup %851  ;;  %804 = vmatprep.subr.bf16.mxu0 %v803_v58 }
  0x26   :  { %806 = vmatpush3.bf16.msra.mxu0 %v803_v58 }
  0x96   :  { %v50_v44 = vpop.xlane.xlu0 %49 }
  0x97   :  { %853 = vrsqrt.f32 %v50_v44 }
  0x9a   :  { %v53_v49 = vpop.xlane.xlu0 %52 }
  0x9b   :  { %855 = vrsqrt.f32 %v53_v49 }
  0xa1   :  { %v854_v46 = vpop.eup %853 }
  0xa2   :  { %v63_v47 = vmul.f32 %v854_v46, %v45_v12  ;;  %v423_v12 = vld [vmem:[%s1083_s6 + $0x28] sm:$0xff] }
  0xa3   :  { %v819_v13 = vpack.c.bf16 %v423_v12, %v422_v11 }
  0xa4   :  { %v66_v48 = vmul.f32 %v852_v45, %v63_v47 }
  0xa5   :  { %v856_v50 = vpop.eup %855 }
  0xa6   :  { %684 = vmatprep.mubr.msk.f32.mxu1 %vm47_vm3, %v66_v48  ;;  %v64_v52 = vmul.f32 %v856_v50, %v46_v14  ;;  %v424_v14 = vld [vmem:[%s1083_s6 + $0x30] sm:$0xff] }
  0xa7   :  { %v823_v16 = vpack.c.bf16 %v425_v15, %v424_v14 }
  0xa8   :  { %v990_v55 = vmul.f32 %v852_v45, %v64_v52 }
  0xd8   :  { %v679_v51 = vpop.f32.mrb[0].mxu0 }
  0xd9   :  { %v145_v53 = vpop.f32.mrb[1].mxu0 }
  0xda   :  { %v771_v54 = vpack.c.bf16 %v679_v51, %v145_v53 }
  0xdc   :  { %772 = vmatprep.subr.bf16.mxu1 %v771_v54 }
  0xdd   :  { %774 = vmatpush3.bf16.msra.mxu1 %v771_v54 }
  0xe0   :  { %685 = vmatmul.mubr.msk.f32.vlgmr.msra.gmra.mrb[0].mxu1 %vm47_vm3, %v990_v55 }
  0xe1   :  { %726 = vmatprep.mubr.msk.f32.mxu1 %vm47_vm3, %v66_v48 }
 0x1b3   :  { %v686_v60 = vpop.f32.mrb[0].mxu1 }
 0x1b4   :  { %v238_v61 = vadd.f32 %v686_v60, %v615_v59  ;;  %v232_v62 = vpop.f32.mrb[1].mxu1 }
 0x1b5   :  { %v233_v63 = vadd.f32 %v615_v59, %v232_v62 }
 0x1b6   :  { %v242_v1 = vmax.f32 %v238_v61, 0.0 }
 0x1b7   :  { %v241_v0 = vmax.f32 %v233_v63, 0.0 }
 0x1b9   :  { %719 = vmatprep.mubr.f32.mxu0 %v241_v0 }
 0x1ba   :  { %720 = vmatmul.mubr.f32.vlgmr.msra.gmra.mrb[2].mxu0 %v242_v1 }
 0x1bb   :  { %768 = vmatprep.mubr.msk.f32.mxu0 %vm47_vm3, %v66_v48 }
 0x28d   :  { %v721_v4 = vpop.f32.mrb[2].mxu0 }
 0x28e   :  { %v326_v5 = vpop.f32.mrb[3].mxu0 }
 0x28f   :  { %v807_v6 = vpack.c.bf16 %v721_v4, %v326_v5 }
 0x291   :  { %808 = vmatprep.subr.bf16.mxu1 %v807_v6 }
 0x292   :  { %810 = vmatpush3.bf16.msra.mxu1 %v807_v6 }
 0x293   :  { %812 = vmatprep.subr.bf16.mxu1 %v811_v7 }
 0x295   :  { %727 = vmatmul.mubr.msk.f32.vlgmr.msra.gmra.mrb[2].mxu1 %vm47_vm3, %v990_v55 }
 0x296   :  { %814 = vmatpush3.bf16.msra.mxu1 %v811_v7 }
 0x297   :  { %816 = vmatprep.subr.bf16.mxu1 %v815_v10 }
 0x29a   :  { %818 = vmatpush3.bf16.msra.mxu1 %v815_v10 }
 0x29b   :  { %820 = vmatprep.subr.bf16.mxu1 %v819_v13 }
 0x29e   :  { %822 = vmatpush3.bf16.msra.mxu1 %v819_v13 }
 0x29f   :  { %824 = vmatprep.subr.bf16.mxu1 %v823_v16 }
 0x2a2   :  { %826 = vmatpush3.bf16.msra.mxu1 %v823_v16 }
 0x2a3   :  { %828 = vmatprep.subr.bf16.mxu1 %v827_v19 }
 0x2a6   :  { %830 = vmatpush3.bf16.msra.mxu1 %v827_v19 }
 0x2a7   :  { %832 = vmatprep.subr.bf16.mxu1 %v831_v22 }
 0x2aa   :  { %834 = vmatpush3.bf16.msra.mxu1 %v831_v22 }
 0x2ab   :  { %836 = vmatprep.subr.bf16.mxu1 %v835_v25 }
 0x2ae   :  { %838 = vmatpush3.bf16.msra.mxu1 %v835_v25 }
 0x2af   :  { %840 = vmatprep.subr.bf16.mxu1 %v839_v28 }
 0x2b2   :  { %842 = vmatpush3.bf16.msra.mxu1 %v839_v28 }
 0x368   :  { %v728_v30 = vpop.f32.mrb[2].mxu1 }
 0x369   :  { %v413_v31 = vadd.f32 %v728_v30, %v618_v29  ;;  %v407_v32 = vpop.f32.mrb[3].mxu1 }
 0x36a   :  { %v408_v33 = vadd.f32 %v618_v29, %v407_v32 }
 0x36b   :  { %v417_v35 = vmax.f32 %v413_v31, 0.0 }
 0x36c   :  { %v416_v34 = vmax.f32 %v408_v33, 0.0 }
 0x36e   :  { %761 = vmatprep.mubr.f32.mxu1 %v416_v34 }
 0x36f   :  { %762 = vmatmul.mubr.f32.vlgmr.msra.gmra.mrb[4].mxu1 %v417_v35 }
 0x442   :  { %v763_v36 = vpop.f32.mrb[4].mxu1 }
 0x443   :  { %v501_v37 = vpop.f32.mrb[5].mxu1 }
 0x444   :  { %v843_v38 = vpack.c.bf16 %v763_v36, %v501_v37 }
 0x446   :  { %844 = vmatprep.subr.bf16.mxu0 %v843_v38 }
 0x447   :  { %846 = vmatpush3.bf16.msra.mxu0 %v843_v38 }
 0x44a   :  { %769 = vmatmul.mubr.msk.f32.vlgmr.msra.gmra.mrb[4].mxu0 %vm47_vm3, %v990_v55 }
 0x51d   :  { %v770_v40 = vpop.f32.mrb[4].mxu0 }
 0x51e   :  { %v588_v41 = vadd.f32 %v770_v40, %v621_v39  ;;  %v582_v42 = vpop.f32.mrb[5].mxu0 }
 0x51f   :  { %v583_v43 = vadd.f32 %v621_v39, %v582_v42 }
 0x520   :  { %v592_v44 = vmax.f32 %v588_v41, 0.0 }
 0x521   :  { %v591_v45 = vmax.f32 %v583_v43, 0.0 }
 0x522   :  { %594 = vst.msk [vmem:[#allocation2 + $0x8] sm:$0xff] %vm47_vm3, %v592_v44 }
 0x523   :  { %593 = vst.msk [vmem:[#allocation2] sm:$0xff] %vm47_vm3, %v591_v45 }
 0x524   :  { %868 = shalt.err (!%p865_p4)
}
 0x525   :  { %s869_s30 = scalar_lea.hbm %s1085_s8, 256 }
 0x526   :  { %p870_p5 = scmp.ne.s32.totalorder %s1085_s8, %s869_s30  ;;  %p873_p6 = scmp.lt.u32.totalorder %s869_s30, %s1085_s8 }
 0x528   :  { %p875_p7 = pnand %p873_p6, %p870_p5 }
 0x52a   :  { %878 = shalt.err (!%p875_p7)
}
 0x52b   :  { %s883_s13 = smov 128   ;;  %s884_s14 = smov 8  }
 0x52c   :  { %606 = dma.vmem_to_hbm [thread:$0]  %s601_s27, 256, %s1085_s8, [#allocation3], %s883_s13, %s883_s13, %s884_s14  }
 0x52d   :  { %879 = dma.done.wait [#allocation3], 256  }
 0x52e   :  { %880 = vsyncadd [#allocation3], 4294967040 }
 0x52f   :  { %610 = vsyncpa [#allocation3], 1 }

</bundles_post_ra>
